<compile_context>
chip_gen: v7x
topology: tpu7x:2x2x1
jax: 0.10.0
libtpu: 0.0.40
codegen_flags: <defaults>
</compile_context>

<pallas_src>
import functools

import jax
import jax.numpy as jnp
import numpy as np
from jax.experimental import pallas as pl
from jax.experimental.pallas import tpu as pltpu


def _round_up(x, m):
    return (x + m - 1) // m * m


def _round_down(x, m):
    return x // m * m


def _pick_tiles(BC, HW, dtype_bytes):
    """Per-generation (TBC, THW) tile sizes for the lane-dense (BC, HW) view."""
    try:
        kind = jax.devices()[0].device_kind.lower()
    except Exception:  # pragma: no cover - fall back to conservative tiles
        kind = ""
    if "v7" in kind:
        tbc_t, thw_t = 256, 4096       # ~4 MiB f32 tile
    elif "v6" in kind:
        tbc_t, thw_t = 128, 4096       # ~2 MiB f32 tile
    else:                              # v5e / unknown: stay under 16 MiB scoped
        tbc_t, thw_t = 128, 2048       # ~1 MiB f32 tile

    # Lane tile: multiple of 128 (or the full extent when HW < 128); never
    # larger than HW so a single edge block does not over-allocate VMEM.
    if HW < 128:
        thw = HW
    else:
        thw = min(thw_t, _round_down(HW, 128))

    # Sublane tile: grow toward the per-generation byte budget when HW is
    # small, cap so the "parallel" bc axis has >= 2 blocks (both v7x
    # TensorCores get pass-1 work), and keep it a multiple of 8 (or == BC).
    tile_budget = tbc_t * thw_t * dtype_bytes
    tbc = max(tbc_t, tile_budget // max(1, thw * dtype_bytes))
    tbc = min(tbc, _round_up(pl.cdiv(BC, 2), 8))
    if BC <= 8:
        tbc = BC
    else:
        tbc = max(8, _round_down(min(tbc, BC), 8))
    return int(tbc), int(thw)


# ----------------------------------------------------------------------------
# Pass 1: spatial sum / max reduction over the lane (flattened H*W) axis.
# ----------------------------------------------------------------------------
def _reduce_kernel(x_ref, sum_ref, max_ref, *, hw, mask_lanes):
    k = pl.program_id(1)
    # f32 accumulation regardless of input dtype (free: VPU cast hidden under
    # the HBM-bound stream).
    x = x_ref[...].astype(jnp.float32)

    if mask_lanes:
        # Lanes past HW in the last hw tile are undefined edge-block data:
        # mask with 0 for the sum and -inf for the max.
        thw = x.shape[-1]
        lane = jax.lax.broadcasted_iota(jnp.int32, x.shape, 1) + k * thw
        valid = lane < hw
        x_sum = jnp.where(valid, x, 0.0)
        x_max = jnp.where(valid, x, -jnp.inf)
    else:
        x_sum = x
        x_max = x

    part_sum = jnp.sum(x_sum, axis=-1, keepdims=True)   # (TBC, 1)
    part_max = jnp.max(x_max, axis=-1, keepdims=True)   # (TBC, 1)

    @pl.when(k == 0)
    def _():
        sum_ref[...] = jnp.zeros_like(sum_ref)
        max_ref[...] = jnp.full_like(max_ref, -jnp.inf)

    sum_ref[...] = sum_ref[...] + part_sum
    max_ref[...] = jnp.maximum(max_ref[...], part_max)
    # NOTE: rows past BC in the last bc tile hold undefined data; their
    # sum/max land in out-of-bounds output rows whose writeback is dropped.


# ----------------------------------------------------------------------------
# Pass 2: broadcast the gate over the spatial axis and scale x.
# ----------------------------------------------------------------------------
def _scale_kernel(x_ref, s_ref, o_ref):
    o_ref[...] = (x_ref[...] * s_ref[...]).astype(o_ref.dtype)


def channel_gate(x, w1, b1, w2, b2):
    """x: (B, C, H, W). Weights stored as (in, out); biases as (1, out)."""
    B, C, H, W = x.shape
    HW = H * W
    BC = B * C

    x2 = x.reshape(BC, HW)
    dtype_bytes = jnp.dtype(x.dtype).itemsize
    TBC, THW = _pick_tiles(BC, HW, dtype_bytes)
    n_bc = pl.cdiv(BC, TBC)
    n_hw = pl.cdiv(HW, THW)
    mask_lanes = (HW % THW) != 0

    # --- Pass 1: per-(b, c) spatial sum & max (f32 accumulation) -------------
    sum_col, max_col = pl.pallas_call(
        functools.partial(_reduce_kernel, hw=HW, mask_lanes=mask_lanes),
        out_shape=(
            jax.ShapeDtypeStruct((BC, 1), jnp.float32),
            jax.ShapeDtypeStruct((BC, 1), jnp.float32),
        ),
        grid_spec=pltpu.PrefetchScalarGridSpec(
            num_scalar_prefetch=0,
            grid=(n_bc, n_hw),
            in_specs=[pl.BlockSpec((TBC, THW), lambda i, k: (i, k))],
            out_specs=(
                pl.BlockSpec((TBC, 1), lambda i, k: (i, 0)),
                pl.BlockSpec((TBC, 1), lambda i, k: (i, 0)),
            ),
        ),
        compiler_params=pltpu.CompilerParams(
            dimension_semantics=("parallel", "arbitrary")),
    )(x2)

    # --- Gate MLP in plain JAX (tiny; XLA fuses it, no extra kernel launch) --
    avg_bc = (sum_col * (1.0 / float(HW))).reshape(B, C)
    max_bc = max_col.reshape(B, C)

    def mlp(p):
        return jnp.maximum(p @ w1 + b1, 0.0) @ w2 + b2

    att = mlp(avg_bc) + mlp(max_bc)              # b2 added twice, as in torch
    scale_col = jax.nn.sigmoid(att).astype(x.dtype).reshape(BC, 1)

    # --- Pass 2: y = x * sigmoid(att), tiled, fully parallel ------------------
    y2 = pl.pallas_call(
        _scale_kernel,
        out_shape=jax.ShapeDtypeStruct((BC, HW), x.dtype),
        grid_spec=pltpu.PrefetchScalarGridSpec(
            num_scalar_prefetch=0,
            grid=(n_bc, n_hw),
            in_specs=[
                pl.BlockSpec((TBC, THW), lambda i, k: (i, k)),
                pl.BlockSpec((TBC, 1), lambda i, k: (i, 0)),
            ],
            out_specs=pl.BlockSpec((TBC, THW), lambda i, k: (i, k)),
        ),
        compiler_params=pltpu.CompilerParams(
            dimension_semantics=("parallel", "parallel")),
    )(x2, scale_col)

    return y2.reshape(B, C, H, W)


def reference(x, w1, b1, w2, b2):
    """Pure-JAX reference of the PyTorch forward (pool_types=['avg','max'])."""
    avg_pool = jnp.mean(x, axis=(2, 3))
    max_pool = jnp.max(x, axis=(2, 3))

    def mlp(p):
        return jnp.maximum(p @ w1 + b1, 0.0) @ w2 + b2

    att = mlp(avg_pool) + mlp(max_pool)
    scale = jax.nn.sigmoid(att)
    return x * scale[:, :, None, None]


if __name__ == "__main__":
    # Module config: gate_channels=32, reduction_ratio=16 -> hidden = 2
    B, C, H, W = 2, 32, 16, 16
    Cr = C // 16

    key = jax.random.PRNGKey(0)
    kx, k1, k2, k3, k4 = jax.random.split(key, 5)

    x = jax.random.normal(kx, (B, C, H, W), dtype=jnp.float32)

    # Torch-style Linear init U(-1/sqrt(fan_in), 1/sqrt(fan_in)), stored
    # transposed (in, out) for right-multiplication; biases as (1, out).
    bound1 = 1.0 / np.sqrt(C)
    bound2 = 1.0 / np.sqrt(Cr)
    w1 = jax.random.uniform(k1, (C, Cr), jnp.float32, -bound1, bound1)
    b1 = jax.random.uniform(k2, (1, Cr), jnp.float32, -bound1, bound1)
    w2 = jax.random.uniform(k3, (Cr, C), jnp.float32, -bound2, bound2)
    b2 = jax.random.uniform(k4, (1, C), jnp.float32, -bound2, bound2)

    fn = jax.jit(channel_gate)
    out = jax.block_until_ready(fn(x, w1, b1, w2, b2))
    ref = jax.block_until_ready(reference(x, w1, b1, w2, b2))

    assert out.shape == (B, C, H, W)
    np.testing.assert_allclose(np.asarray(out), np.asarray(ref),
                               rtol=1e-5, atol=1e-5)

    print("KERNEL_OK")
</pallas_src>

<mosaic_0001>
module attributes {stable_mosaic.version = 11 : i64} {
  func.func @_reduce_kernel(%arg0: i32, %arg1: i32, %arg2: memref<32x256xf32, #tpu.memory_space<vmem>>, %arg3: memref<32x1xf32, #tpu.memory_space<vmem>>, %arg4: memref<32x1xf32, #tpu.memory_space<vmem>>) attributes {dimension_semantics = [#tpu.dimension_semantics<parallel>, #tpu.dimension_semantics<arbitrary>], iteration_bounds = array<i64: 2, 1>, scalar_prefetch = 0 : i64, scratch_operands = 0 : i64, tpu.core_type = #tpu.core_type<tc>, window_params = [{transform_indices = @transform_0, window_bounds = array<i64: 32, 256>}, {transform_indices = @transform_1, window_bounds = array<i64: 32, 1>}, {transform_indices = @transform_2, window_bounds = array<i64: 32, 1>}]} {
    %c0 = arith.constant 0 : index
    %c0_0 = arith.constant 0 : index
    %0 = vector.load %arg2[%c0, %c0_0] : memref<32x256xf32, #tpu.memory_space<vmem>>, vector<32x256xf32>
    %cst = arith.constant dense<0.000000e+00> : vector<32xf32>
    %1 = vector.multi_reduction <add>, %0, %cst [1] : vector<32x256xf32> to vector<32xf32>
    %2 = vector.shape_cast %1 : vector<32xf32> to vector<32x1xf32>
    %cst_1 = arith.constant dense<0xFF800000> : vector<32xf32>
    %3 = vector.multi_reduction <maximumf>, %0, %cst_1 [1] : vector<32x256xf32> to vector<32xf32>
    %4 = vector.shape_cast %3 : vector<32xf32> to vector<32x1xf32>
    %c0_i32 = arith.constant 0 : i32
    %5 = arith.cmpi eq, %arg1, %c0_i32 : i32
    %6 = arith.extui %5 : i1 to i32
    %c0_i32_2 = arith.constant 0 : i32
    %7 = arith.cmpi ne, %6, %c0_i32_2 : i32
    scf.if %7 {
      %cst_11 = arith.constant 0.000000e+00 : f32
      %14 = vector.broadcast %cst_11 : f32 to vector<32x1xf32>
      %c0_12 = arith.constant 0 : index
      %c0_13 = arith.constant 0 : index
      %15 = vector.load %arg3[%c0_12, %c0_13] : memref<32x1xf32, #tpu.memory_space<vmem>>, vector<32x1xf32>
      tpu.vector_store %arg3[%c0_12, %c0_13], %14 {strides = array<i32>} : memref<32x1xf32, #tpu.memory_space<vmem>>, vector<32x1xf32>,
      %cst_14 = arith.constant 0xFF800000 : f32
      %16 = vector.broadcast %cst_14 : f32 to vector<32x1xf32>
      %c0_15 = arith.constant 0 : index
      %c0_16 = arith.constant 0 : index
      %17 = vector.load %arg4[%c0_15, %c0_16] : memref<32x1xf32, #tpu.memory_space<vmem>>, vector<32x1xf32>
      tpu.vector_store %arg4[%c0_15, %c0_16], %16 {strides = array<i32>} : memref<32x1xf32, #tpu.memory_space<vmem>>, vector<32x1xf32>,
    } else {
    }
    %c0_3 = arith.constant 0 : index
    %c0_4 = arith.constant 0 : index
    %8 = vector.load %arg3[%c0_3, %c0_4] : memref<32x1xf32, #tpu.memory_space<vmem>>, vector<32x1xf32>
    %9 = arith.addf %8, %2 : vector<32x1xf32>
    %c0_5 = arith.constant 0 : index
    %c0_6 = arith.constant 0 : index
    %10 = vector.load %arg3[%c0_5, %c0_6] : memref<32x1xf32, #tpu.memory_space<vmem>>, vector<32x1xf32>
    tpu.vector_store %arg3[%c0_5, %c0_6], %9 {strides = array<i32>} : memref<32x1xf32, #tpu.memory_space<vmem>>, vector<32x1xf32>,
    %c0_7 = arith.constant 0 : index
    %c0_8 = arith.constant 0 : index
    %11 = vector.load %arg4[%c0_7, %c0_8] : memref<32x1xf32, #tpu.memory_space<vmem>>, vector<32x1xf32>
    %12 = arith.maximumf %11, %4 : vector<32x1xf32>
    %c0_9 = arith.constant 0 : index
    %c0_10 = arith.constant 0 : index
    %13 = vector.load %arg4[%c0_9, %c0_10] : memref<32x1xf32, #tpu.memory_space<vmem>>, vector<32x1xf32>
    tpu.vector_store %arg4[%c0_9, %c0_10], %12 {strides = array<i32>} : memref<32x1xf32, #tpu.memory_space<vmem>>, vector<32x1xf32>,
    return
  }
  func.func @transform_0(%arg0: i32, %arg1: i32) -> (i32, i32) {
    %c0_i32 = arith.constant 0 : i32
    return %arg0, %arg1 : i32, i32
  }
  func.func @transform_1(%arg0: i32, %arg1: i32) -> (i32, i32) {
    %c0_i32 = arith.constant 0 : i32
    %c0_i32_0 = arith.constant 0 : i32
    return %arg0, %c0_i32 : i32, i32
  }
  func.func @transform_2(%arg0: i32, %arg1: i32) -> (i32, i32) {
    %c0_i32 = arith.constant 0 : i32
    %c0_i32_0 = arith.constant 0 : i32
    return %arg0, %c0_i32 : i32, i32
  }
}

module attributes {stable_mosaic.version = 11 : i64} {
  func.func @_scale_kernel(%arg0: i32, %arg1: i32, %arg2: memref<32x256xf32, #tpu.memory_space<vmem>>, %arg3: memref<32x1xf32, #tpu.memory_space<vmem>>, %arg4: memref<32x256xf32, #tpu.memory_space<vmem>>) attributes {dimension_semantics = [#tpu.dimension_semantics<parallel>, #tpu.dimension_semantics<parallel>], iteration_bounds = array<i64: 2, 1>, scalar_prefetch = 0 : i64, scratch_operands = 0 : i64, tpu.core_type = #tpu.core_type<tc>, window_params = [{transform_indices = @transform_0, window_bounds = array<i64: 32, 256>}, {transform_indices = @transform_1, window_bounds = array<i64: 32, 1>}, {transform_indices = @transform_2, window_bounds = array<i64: 32, 256>}]} {
    %c0 = arith.constant 0 : index
    %c0_0 = arith.constant 0 : index
    %0 = vector.load %arg2[%c0, %c0_0] : memref<32x256xf32, #tpu.memory_space<vmem>>, vector<32x256xf32>
    %c0_1 = arith.constant 0 : index
    %c0_2 = arith.constant 0 : index
    %1 = vector.load %arg3[%c0_1, %c0_2] : memref<32x1xf32, #tpu.memory_space<vmem>>, vector<32x1xf32>
    %2 = vector.broadcast %1 : vector<32x1xf32> to vector<32x256xf32>
    %3 = arith.mulf %0, %2 : vector<32x256xf32>
    %c0_3 = arith.constant 0 : index
    %c0_4 = arith.constant 0 : index
    %4 = vector.load %arg4[%c0_3, %c0_4] : memref<32x256xf32, #tpu.memory_space<vmem>>, vector<32x256xf32>
    tpu.vector_store %arg4[%c0_3, %c0_4], %3 {strides = array<i32>} : memref<32x256xf32, #tpu.memory_space<vmem>>, vector<32x256xf32>,
    return
  }
  func.func @transform_0(%arg0: i32, %arg1: i32) -> (i32, i32) {
    %c0_i32 = arith.constant 0 : i32
    return %arg0, %arg1 : i32, i32
  }
  func.func @transform_1(%arg0: i32, %arg1: i32) -> (i32, i32) {
    %c0_i32 = arith.constant 0 : i32
    %c0_i32_0 = arith.constant 0 : i32
    return %arg0, %c0_i32 : i32, i32
  }
  func.func @transform_2(%arg0: i32, %arg1: i32) -> (i32, i32) {
    %c0_i32 = arith.constant 0 : i32
    return %arg0, %arg1 : i32, i32
  }
}

</mosaic_0001>

<bundles_post_ra>
// kernel: channel_gate.2
= control target key start
LH: loop header
LB: loop body
LE: loop exit
PB: predicated region body
PF: predicated region fallthrough
CT: control target
= control target key end

     0   :  { %s449_s9 = smov 0   ;;  %s451_s10 = smov 0   ;;  %s529_s0 = inlined_call_operand.vmem [shape: f32[64,256], index: 0, kind: input, shape index: {}]   ;;  %s530_s1 = inlined_call_operand.vmem [shape: f32[64,1], index: 1, kind: output, shape index: {0}]   ;;  %s531_s2 = inlined_call_operand.vmem [shape: f32[64,1], index: 2, kind: output, shape index: {1}]  }
   0x1   :  { %s453_s11 = smov 0  }
   0x2 LB: > { %s25_s12 = sadd.s32 1, %s426_s10  ;;  %p371_p0 = scmp.ge.s32.totalorder %s430_s11, 1  ;;  %s430_s11 = sphi %s453_s11, %s13_s11   ;;  %s426_s10 = sphi %s451_s10, %s533_s10   ;;  %s422_s9 = sphi %s449_s9, %s532_s9  }
   0x3   : > { %p27_p1 = scmp.ge.s32.totalorder %s25_s12, 2  ;;  %p136_p2 = scmp.lt.s32.totalorder %s430_s11, 3 }
   0x5   : > { %s535_s12 = smov (%p27_p1, %s25_s12), 0  ;;  %p137_p3 = pnand %p371_p0, %p136_p2 }
   0x6   : > { %s372_s13 = sshll.u32 (!%p137_p3), %s422_s9, 2  ;;  %vm228_vm0 = vcmask (!%p137_p3), 7168   ;;  %v432_v3 = vmov (!%p137_p3), 0.0   ;;  %v433_v16 = vmov (!%p137_p3), -inf  }
   0x7   : > { %140 = sbr.rel (%p137_p3) target bundleno = 178 (0xb2), region = 24  ;;  %p170_p4 = scmp.lt.s32.totalorder (!%p137_p3), %s372_s13, 7 }
   0xe   : > { %s537_s13 = smov (!%p170_p4, %s372_s13), 7 }
   0xf   : > { %s381_s14 = sshll.u32 %s537_s13, 4  ;;  %s376_s15 = sshll.u32 %s537_s13, 3 }
  0x10   : > { %s177_s18 = scalar_lea.vmem %s529_s0, %s381_s14  ;;  %s473_s21 = scalar_lea.vmem %s530_s1, %s376_s15 }
  0x11   : > { %v194_v0 = vld [vmem:[%s177_s18 + $0x10] sm:$0xff]  ;;  %v195_v1 = vld [vmem:[%s177_s18 + $0x18] sm:$0xff]  ;;  %v192_v2 = vld [vmem:[%s177_s18] sm:$0xff]  ;;  %229 = vst.msk [vmem:[%s473_s21] sm:$0xff] %vm228_vm0, %v432_v3  ;;  %s486_s24 = scalar_lea.vmem %s531_s2, %s376_s15 }
  0x12   : > { %v203_v4 = vadd.f32 %v195_v1, %v194_v0  ;;  %v193_v5 = vld [vmem:[%s177_s18 + $0x8] sm:$0xff]  ;;  %230 = vst.msk [vmem:[%s473_s21 + $0x8] sm:$0xff] %vm228_vm0, %v432_v3  ;;  %231 = vst.msk [vmem:[%s473_s21 + $0x10] sm:$0xff] %vm228_vm0, %v432_v3  ;;  %v215_v7 = vmax.f32 %v194_v0, %v195_v1  ;;  %v196_v9 = vld [vmem:[%s177_s18 + $0x20] sm:$0xff] }
  0x13   : > { %v200_v6 = vadd.f32 %v193_v5, %v192_v2  ;;  %232 = vst.msk [vmem:[%s473_s21 + $0x18] sm:$0xff] %vm228_vm0, %v432_v3  ;;  %v212_v8 = vmax.f32 %v192_v2, %v193_v5  ;;  %v197_v10 = vld [vmem:[%s177_s18 + $0x28] sm:$0xff]  ;;  %v198_v13 = vld [vmem:[%s177_s18 + $0x30] sm:$0xff]  ;;  %v199_v14 = vld [vmem:[%s177_s18 + $0x38] sm:$0xff] }
  0x14   : > { %204 = vadd.xlane.f32.xlu1 %v203_v4  ;;  %v218_v11 = vmax.f32 %v196_v9, %v197_v10  ;;  %v206_v12 = vadd.f32 %v197_v10, %v196_v9  ;;  %v221_v15 = vmax.f32 %v198_v13, %v199_v14  ;;  %233 = vst.msk [vmem:[%s486_s24] sm:$0xff] %vm228_vm0, %v433_v16  ;;  %234 = vst.msk [vmem:[%s486_s24 + $0x8] sm:$0xff] %vm228_vm0, %v433_v16 }
  0x15   : > { %201 = vadd.xlane.f32.xlu0 %v200_v6  ;;  %v209_v17 = vadd.f32 %v199_v14, %v198_v13  ;;  %235 = vst.msk [vmem:[%s486_s24 + $0x10] sm:$0xff] %vm228_vm0, %v433_v16  ;;  %236 = vst.msk [vmem:[%s486_s24 + $0x18] sm:$0xff] %vm228_vm0, %v433_v16 }
  0x18   : > { %216 = vmax.xlane.f32.xlu1 %v215_v7  ;;  %v237_v19 = vld [vmem:[%s473_s21] sm:$0xff] }
  0x19   : > { %213 = vmax.xlane.f32.xlu0 %v212_v8  ;;  %v238_v18 = vld [vmem:[%s473_s21 + $0x8] sm:$0xff]  ;;  %v239_v23 = vld [vmem:[%s473_s21 + $0x10] sm:$0xff] }
  0x1a   : > { %v240_v24 = vld [vmem:[%s473_s21 + $0x18] sm:$0xff] }
  0x1b   : > { %v251_v26 = vld [vmem:[%s486_s24 + $0x8] sm:$0xff]  ;;  %v250_v27 = vld [vmem:[%s486_s24] sm:$0xff] }
  0x1c   : > { %219 = vmax.xlane.f32.xlu1 %v218_v11  ;;  %v252_v31 = vld [vmem:[%s486_s24 + $0x10] sm:$0xff]  ;;  %v253_v32 = vld [vmem:[%s486_s24 + $0x18] sm:$0xff] }
  0x1d   : > { %207 = vadd.xlane.f32.xlu0 %v206_v12 }
  0x20   : > { %222 = vmax.xlane.f32.xlu1 %v221_v15 }
  0x21   : > { %210 = vadd.xlane.f32.xlu0 %v209_v17 }
  0xa1   : > { %v205_v20 = vpop.xlane.xlu1 %204 }
  0xa2   : > { %v242_v21 = vadd.f32 %v238_v18, %v205_v20  ;;  %v202_v22 = vpop.xlane.xlu0 %201 }
  0xa3   : > { %v241_v25 = vadd.f32 %v237_v19, %v202_v22 }
  0xa4   : > { %247 = vst.msk [vmem:[%s473_s21 + $0x8] sm:$0xff] %vm228_vm0, %v242_v21 }
  0xa5   : > { %v217_v28 = vpop.xlane.xlu1 %216  ;;  %246 = vst.msk [vmem:[%s473_s21] sm:$0xff] %vm228_vm0, %v241_v25 }
  0xa6   : > { %v255_v29 = vmax.f32 %v251_v26, %v217_v28  ;;  %v214_v30 = vpop.xlane.xlu0 %213 }
  0xa7   : > { %v254_v33 = vmax.f32 %v250_v27, %v214_v30 }
  0xa8   : > { %259 = vst.msk [vmem:[%s486_s24 + $0x8] sm:$0xff] %vm228_vm0, %v255_v29 }
  0xa9   : > { %v220_v34 = vpop.xlane.xlu1 %219  ;;  %258 = vst.msk [vmem:[%s486_s24] sm:$0xff] %vm228_vm0, %v254_v33 }
  0xaa   : > { %v256_v35 = vmax.f32 %v252_v31, %v220_v34  ;;  %v208_v36 = vpop.xlane.xlu0 %207 }
  0xab   : > { %v243_v37 = vadd.f32 %v239_v23, %v208_v36 }
  0xac   : > { %260 = vst.msk [vmem:[%s486_s24 + $0x10] sm:$0xff] %vm228_vm0, %v256_v35 }
  0xad   : > { %v223_v38 = vpop.xlane.xlu1 %222  ;;  %248 = vst.msk [vmem:[%s473_s21 + $0x10] sm:$0xff] %vm228_vm0, %v243_v37 }
  0xae   : > { %v257_v39 = vmax.f32 %v253_v32, %v223_v38  ;;  %v211_v40 = vpop.xlane.xlu0 %210 }
  0xaf   : > { %v244_v41 = vadd.f32 %v240_v24, %v211_v40 }
  0xb0   : > { %261 = vst.msk [vmem:[%s486_s24 + $0x18] sm:$0xff] %vm228_vm0, %v257_v39 }
  0xb1   : > { %249 = vst.msk [vmem:[%s473_s21 + $0x18] sm:$0xff] %vm228_vm0, %v244_v41 }
  0xb2 PF: > { %s13_s11 = sadd.s32 1, %s430_s11   ;;  %s532_s9 = smov %s426_s10 }
  0xb3   : > { %p10_p5 = scmp.ge.s32.totalorder %s13_s11, 4   ;;  %s533_s10 = smov %s535_s12 }
  0xb5   :  { %12 = sbr.rel (!%p10_p5) target bundleno = 2 (0x2), region = 70 }

// kernel: channel_gate.3
= control target key start
LH: loop header
LB: loop body
LE: loop exit
PB: predicated region body
PF: predicated region fallthrough
CT: control target
= control target key end

     0   :  { %s447_s9 = smov 0   ;;  %s449_s10 = smov 0   ;;  %s483_s0 = inlined_call_operand.vmem [shape: f32[64,256], index: 0, kind: input, shape index: {}]   ;;  %s484_s1 = inlined_call_operand.vmem [shape: f32[64,1], index: 1, kind: input, shape index: {}]   ;;  %s485_s2 = inlined_call_operand.vmem [shape: f32[64,256], index: 2, kind: output, shape index: {}]  }
   0x1   :  { %s451_s11 = smov 0  }
   0x2 LB: > { %s24_s12 = sadd.s32 1, %s425_s10  ;;  %p367_p0 = scmp.ge.s32.totalorder %s429_s11, 1  ;;  %s429_s11 = sphi %s451_s11, %s12_s11   ;;  %s425_s10 = sphi %s449_s10, %s487_s10   ;;  %s421_s9 = sphi %s447_s9, %s486_s9  }
   0x3   : > { %p26_p1 = scmp.ge.s32.totalorder %s24_s12, 2  ;;  %p146_p2 = scmp.lt.s32.totalorder %s429_s11, 3 }
   0x5   : > { %s489_s12 = smov (%p26_p1, %s24_s12), 0  ;;  %p147_p3 = pnand %p367_p0, %p146_p2 }
   0x6   : > { %s368_s13 = sshll.u32 (!%p147_p3), %s421_s9, 2  ;;  %v431_v0 = vmov (!%p147_p3), 0  }
   0x7   : > { %150 = sbr.rel (%p147_p3) target bundleno = 154 (0x9a), region = 28  ;;  %406 = vset.pattern.permute.xlu1 (!%p147_p3), %v431_v0  ;;  %405 = vset.pattern.permute.xlu0 (!%p147_p3), %v431_v0  ;;  %p185_p4 = scmp.lt.s32.totalorder (!%p147_p3), %s368_s13, 7 }
   0xe   : > { %s491_s13 = smov (!%p185_p4, %s368_s13), 7 }
   0xf   : > { %s372_s14 = sshll.u32 %s491_s13, 3  ;;  %s378_s18 = sshll.u32 %s491_s13, 4 }
  0x10   : > { %s199_s17 = scalar_lea.vmem %s484_s1, %s372_s14  ;;  %s192_s21 = scalar_lea.vmem %s483_s0, %s378_s18 }
  0x11   : > { %v223_v1 = vld [vmem:[%s199_s17 + $0x10] sm:$0xff]  ;;  %v221_v2 = vld [vmem:[%s199_s17] sm:$0xff]  ;;  %v224_v3 = vld [vmem:[%s199_s17 + $0x18] sm:$0xff]  ;;  %s210_s24 = scalar_lea.vmem %s485_s2, %s378_s18 }
  0x12   : > { %237 = vperm.xlu1 %406, %v223_v1   ;;  %227 = vperm.xlu0 %405, %v221_v2   ;;  %v222_v4 = vld [vmem:[%s199_s17 + $0x8] sm:$0xff]  ;;  %v213_v5 = vld [vmem:[%s192_s21] sm:$0xff]  ;;  %v215_v11 = vld [vmem:[%s192_s21 + $0x10] sm:$0xff] }
  0x13   : > { %v214_v6 = vld [vmem:[%s192_s21 + $0x8] sm:$0xff]  ;;  %v216_v12 = vld [vmem:[%s192_s21 + $0x18] sm:$0xff]  ;;  %v217_v13 = vld [vmem:[%s192_s21 + $0x20] sm:$0xff] }
  0x14   : > { %v218_v14 = vld [vmem:[%s192_s21 + $0x28] sm:$0xff]  ;;  %v219_v16 = vld [vmem:[%s192_s21 + $0x30] sm:$0xff]  ;;  %v220_v17 = vld [vmem:[%s192_s21 + $0x38] sm:$0xff] }
  0x16   : > { %242 = vperm.xlu1 %406, %v224_v3   ;;  %232 = vperm.xlu0 %405, %v222_v4  }
  0x91   : > { %v238_v7 = vpop.permute.xlu1 %237  ;;  %v228_v8 = vpop.permute.xlu0 %227 }
  0x92   : > { %v245_v9 = vmul.f32 %v228_v8, %v213_v5  ;;  %v246_v10 = vmul.f32 %v228_v8, %v214_v6  ;;  %v249_v21 = vmul.f32 %v238_v7, %v217_v13  ;;  %v250_v22 = vmul.f32 %v238_v7, %v218_v14 }
  0x94   : > { %253 = vst [vmem:[%s210_s24] sm:$0xff] %v245_v9  ;;  %254 = vst [vmem:[%s210_s24 + $0x8] sm:$0xff] %v246_v10 }
  0x95   : > { %v243_v15 = vpop.permute.xlu1 %242  ;;  %v233_v18 = vpop.permute.xlu0 %232  ;;  %257 = vst [vmem:[%s210_s24 + $0x20] sm:$0xff] %v249_v21  ;;  %258 = vst [vmem:[%s210_s24 + $0x28] sm:$0xff] %v250_v22 }
  0x96   : > { %v247_v19 = vmul.f32 %v233_v18, %v215_v11  ;;  %v248_v20 = vmul.f32 %v233_v18, %v216_v12  ;;  %v251_v23 = vmul.f32 %v243_v15, %v219_v16  ;;  %v252_v24 = vmul.f32 %v243_v15, %v220_v17 }
  0x98   : > { %255 = vst [vmem:[%s210_s24 + $0x10] sm:$0xff] %v247_v19  ;;  %256 = vst [vmem:[%s210_s24 + $0x18] sm:$0xff] %v248_v20 }
  0x99   : > { %259 = vst [vmem:[%s210_s24 + $0x30] sm:$0xff] %v251_v23  ;;  %260 = vst [vmem:[%s210_s24 + $0x38] sm:$0xff] %v252_v24 }
  0x9a PF: > { %s12_s11 = sadd.s32 1, %s429_s11   ;;  %s486_s9 = smov %s425_s10 }
  0x9b   : > { %p9_p5 = scmp.ge.s32.totalorder %s12_s11, 4   ;;  %s487_s10 = smov %s489_s12 }
  0x9d   :  { %11 = sbr.rel (!%p9_p5) target bundleno = 2 (0x2), region = 61 }

</bundles_post_ra>
